<compile_context>
chip_gen: v6e
topology: v6e:2x2x1
jax: 0.10.0
libtpu: 0.0.40
codegen_flags: <defaults>
</compile_context>

<pallas_src>
import jax
import jax.numpy as jnp
from jax.experimental import pallas as pl
from jax.experimental.pallas import tpu as pltpu


def _round_up(x, m):
    return ((x + m - 1) // m) * m


def _upsample_mm_kernel(x_ref, w_ref, o_ref):
    # x_ref: (Cin, ts)      -- channels on sublanes, pixels lane-dense
    # w_ref: (Cout*4, Cin)  -- tiny, constant across the grid
    # o_ref: (Cout*4, ts)   -- lane-dense output tile (unmasked vst)
    x = x_ref[...]
    w = w_ref[...]
    cin = x.shape[0]
    if cin <= 16:
        # Tiny K: skip the MXU, do Cin broadcast-FMAs on the VPU (free against
        # the memory bottleneck), accumulate in f32.
        acc = w[:, 0:1].astype(jnp.float32) * x[0:1, :].astype(jnp.float32)
        for ci in range(1, cin):
            acc = acc + (w[:, ci:ci + 1].astype(jnp.float32)
                         * x[ci:ci + 1, :].astype(jnp.float32))
    else:
        acc = jnp.dot(w, x, preferred_element_type=jnp.float32)
    o_ref[...] = acc.astype(o_ref.dtype)


def _pick_spatial_tile(hw, cin, cout4, dtype_bytes=4):
    """Choose the spatial (lane) tile size and the padded spatial extent."""
    LANE = 128
    # Budget for the double-buffered (input block + output block) working set.
    # Conservative enough for v7x's 64 MiB physical VMEM and v5e once the
    # scoped limit is raised.
    budget = 16 * 1024 * 1024
    per_pos = dtype_bytes * (cin + cout4)  # bytes per spatial position (in + out)
    cap = max(LANE, min(2048, (budget // (2 * per_pos)) // LANE * LANE))
    hw128 = _round_up(hw, LANE)
    ts = min(cap, hw128)
    # Prefer a tile that evenly divides the 128-padded extent (avoids DMA /
    # compute on zero-padded columns in the last tile).
    for cand in range(ts, max(LANE, ts - 8 * LANE) - 1, -LANE):
        if hw128 % cand == 0:
            ts = cand
            break
    hw_pad = _round_up(hw, ts)
    return ts, hw_pad


def upsample_conv_transpose2d(x, weight):
    """x: (N, Cin, H, W) f32; weight: (Cin, Cout, 2, 2) f32 (PyTorch layout).

    Returns (N, Cout, 2H, 2W), matching
    nn.ConvTranspose2d(Cin, Cout, kernel_size=2, stride=2, padding=0, bias=False).
    """
    N, Cin, H, W = x.shape
    Cin_w, Cout, KH, KW = weight.shape
    assert Cin == Cin_w and KH == 2 and KW == 2
    Cout4 = Cout * 4
    hw = H * W

    # --- cheap layout glue (pure reshapes, no data movement for x) ---
    x_flat = x.reshape(N, Cin, hw)                          # (N, Cin, HW)
    w_flat = jnp.transpose(weight.reshape(Cin, Cout4), (1, 0))  # (Cout*4, Cin)

    ts, hw_pad = _pick_spatial_tile(hw, Cin, Cout4)
    if hw_pad != hw:
        x_flat = jnp.pad(x_flat, ((0, 0), (0, 0), (0, hw_pad - hw)))

    grid = (N, hw_pad // ts)

    # Explicit VMEM limit (v5e default scoped VMEM is only 16 MiB; keep well
    # under v7x's 64 MiB physical).
    block_bytes = 4 * ts * (Cin + Cout4)          # one input + one output block (f32)
    w_bytes = 4 * Cout4 * Cin
    vmem_limit = 2 * block_bytes + 2 * w_bytes + (4 << 20)
    vmem_limit = int(min(max(vmem_limit, 16 << 20), 48 << 20))

    y = pl.pallas_call(
        _upsample_mm_kernel,
        out_shape=jax.ShapeDtypeStruct((N, Cout4, hw_pad), jnp.float32),
        grid_spec=pltpu.PrefetchScalarGridSpec(
            num_scalar_prefetch=0,
            grid=grid,
            in_specs=[
                # batch dim squeezed; channels full-extent; pixels lane-dense tile
                pl.BlockSpec((None, Cin, ts), lambda n, s: (n, 0, s)),
                # whole (tiny) weight, constant across the grid
                pl.BlockSpec((Cout4, Cin), lambda n, s: (0, 0)),
            ],
            out_specs=pl.BlockSpec((None, Cout4, ts), lambda n, s: (n, 0, s)),
        ),
        compiler_params=pltpu.CompilerParams(
            dimension_semantics=("parallel", "parallel"),
            vmem_limit_bytes=vmem_limit,
        ),
    )(x_flat, w_flat)

    if hw_pad != hw:
        y = y[:, :, :hw]

    # --- un-interleave the 2x2 sub-blocks back to NCHW (XLA transpose) ---
    # (N, Cout*4, HW) -> (N, Cout, ki, kj, H, W) -> (N, Cout, H, ki, W, kj) -> (N, Cout, 2H, 2W)
    y = y.reshape(N, Cout, 2, 2, H, W)
    y = jnp.transpose(y, (0, 1, 4, 2, 5, 3)).reshape(N, Cout, 2 * H, 2 * W)
    return y


def _reference(x, weight):
    # pure-JAX reference for ConvTranspose2d(k=2, s=2, p=0, bias=False)
    N, Cin, H, W = x.shape
    _, Cout, _, _ = weight.shape
    y = jnp.einsum("nchw,cokl->nohkwl", x, weight)  # (N, Cout, H, 2, W, 2)
    return y.reshape(N, Cout, 2 * H, 2 * W)


if __name__ == "__main__":
    key = jax.random.PRNGKey(0)
    k_x, k_w = jax.random.split(key)

    N, Cin, Cout, H, W = 2, 4, 8, 16, 16
    x = jax.random.normal(k_x, (N, Cin, H, W), dtype=jnp.float32)
    # deterministic "parameter init" (shape matches nn.ConvTranspose2d weight)
    weight = jax.random.normal(k_w, (Cin, Cout, 2, 2), dtype=jnp.float32) * 0.1

    upsample = jax.jit(upsample_conv_transpose2d)
    out = upsample(x, weight)
    out = jax.block_until_ready(out)

    ref = _reference(x, weight)
    assert out.shape == (N, Cout, 2 * H, 2 * W), out.shape
    assert jnp.allclose(out, ref, atol=1e-5, rtol=1e-5), "mismatch vs reference"

    print("KERNEL_OK")
</pallas_src>

<mosaic_0001>
module attributes {stable_mosaic.version = 11 : i64} {
  func.func @_upsample_mm_kernel(%arg0: i32, %arg1: i32, %arg2: memref<1x4x256xf32, #tpu.memory_space<vmem>>, %arg3: memref<32x4xf32, #tpu.memory_space<vmem>>, %arg4: memref<1x32x256xf32, #tpu.memory_space<vmem>>) attributes {dimension_semantics = [#tpu.dimension_semantics<parallel>, #tpu.dimension_semantics<parallel>], iteration_bounds = array<i64: 2, 1>, scalar_prefetch = 0 : i64, scratch_operands = 0 : i64, tpu.core_type = #tpu.core_type<tc>, window_params = [{transform_indices = @transform_0, window_bounds = array<i64: 1, 4, 256>}, {pipeline_mode = #tpu.pipeline_mode<synchronous>, transform_indices = @transform_1, window_bounds = array<i64: 32, 4>}, {transform_indices = @transform_2, window_bounds = array<i64: 1, 32, 256>}]} {
    %c0 = arith.constant 0 : index
    %c0_0 = arith.constant 0 : index
    %c0_1 = arith.constant 0 : index
    %0 = vector.load %arg2[%c0, %c0_0, %c0_1] : memref<1x4x256xf32, #tpu.memory_space<vmem>>, vector<1x4x256xf32>
    %1 = vector.shape_cast %0 : vector<1x4x256xf32> to vector<4x256xf32>
    %c0_2 = arith.constant 0 : index
    %c0_3 = arith.constant 0 : index
    %2 = vector.load %arg3[%c0_2, %c0_3] : memref<32x4xf32, #tpu.memory_space<vmem>>, vector<32x4xf32>
    %3 = vector.extract_strided_slice %2 {offsets = [0, 0], sizes = [32, 1], strides = [1, 1]} : vector<32x4xf32> to vector<32x1xf32>
    %4 = vector.extract_strided_slice %1 {offsets = [0, 0], sizes = [1, 256], strides = [1, 1]} : vector<4x256xf32> to vector<1x256xf32>
    %5 = vector.broadcast %3 : vector<32x1xf32> to vector<32x256xf32>
    %6 = vector.broadcast %4 : vector<1x256xf32> to vector<32x256xf32>
    %7 = arith.mulf %5, %6 : vector<32x256xf32>
    %8 = vector.extract_strided_slice %2 {offsets = [0, 1], sizes = [32, 1], strides = [1, 1]} : vector<32x4xf32> to vector<32x1xf32>
    %9 = vector.extract_strided_slice %1 {offsets = [1, 0], sizes = [1, 256], strides = [1, 1]} : vector<4x256xf32> to vector<1x256xf32>
    %10 = vector.broadcast %8 : vector<32x1xf32> to vector<32x256xf32>
    %11 = vector.broadcast %9 : vector<1x256xf32> to vector<32x256xf32>
    %12 = arith.mulf %10, %11 : vector<32x256xf32>
    %13 = arith.addf %7, %12 : vector<32x256xf32>
    %14 = vector.extract_strided_slice %2 {offsets = [0, 2], sizes = [32, 1], strides = [1, 1]} : vector<32x4xf32> to vector<32x1xf32>
    %15 = vector.extract_strided_slice %1 {offsets = [2, 0], sizes = [1, 256], strides = [1, 1]} : vector<4x256xf32> to vector<1x256xf32>
    %16 = vector.broadcast %14 : vector<32x1xf32> to vector<32x256xf32>
    %17 = vector.broadcast %15 : vector<1x256xf32> to vector<32x256xf32>
    %18 = arith.mulf %16, %17 : vector<32x256xf32>
    %19 = arith.addf %13, %18 : vector<32x256xf32>
    %20 = vector.extract_strided_slice %2 {offsets = [0, 3], sizes = [32, 1], strides = [1, 1]} : vector<32x4xf32> to vector<32x1xf32>
    %21 = vector.extract_strided_slice %1 {offsets = [3, 0], sizes = [1, 256], strides = [1, 1]} : vector<4x256xf32> to vector<1x256xf32>
    %22 = vector.broadcast %20 : vector<32x1xf32> to vector<32x256xf32>
    %23 = vector.broadcast %21 : vector<1x256xf32> to vector<32x256xf32>
    %24 = arith.mulf %22, %23 : vector<32x256xf32>
    %25 = arith.addf %19, %24 : vector<32x256xf32>
    %c0_4 = arith.constant 0 : index
    %c0_5 = arith.constant 0 : index
    %c0_6 = arith.constant 0 : index
    %26 = vector.load %arg4[%c0_4, %c0_5, %c0_6] : memref<1x32x256xf32, #tpu.memory_space<vmem>>, vector<1x32x256xf32>
    %27 = vector.shape_cast %26 : vector<1x32x256xf32> to vector<32x256xf32>
    %28 = vector.shape_cast %25 : vector<32x256xf32> to vector<1x32x256xf32>
    tpu.vector_store %arg4[%c0_4, %c0_5, %c0_6], %28 {strides = array<i32>} : memref<1x32x256xf32, #tpu.memory_space<vmem>>, vector<1x32x256xf32>,
    return
  }
  func.func @transform_0(%arg0: i32, %arg1: i32) -> (i32, i32, i32) {
    %c0_i32 = arith.constant 0 : i32
    %c0_i32_0 = arith.constant 0 : i32
    return %arg0, %c0_i32, %arg1 : i32, i32, i32
  }
  func.func @transform_1(%arg0: i32, %arg1: i32) -> (i32, i32) {
    %c0_i32 = arith.constant 0 : i32
    %c0_i32_0 = arith.constant 0 : i32
    %c0_i32_1 = arith.constant 0 : i32
    return %c0_i32, %c0_i32_0 : i32, i32
  }
  func.func @transform_2(%arg0: i32, %arg1: i32) -> (i32, i32, i32) {
    %c0_i32 = arith.constant 0 : i32
    %c0_i32_0 = arith.constant 0 : i32
    return %arg0, %c0_i32, %arg1 : i32, i32, i32
  }
}

</mosaic_0001>

<bundles_post_ra>
// kernel: upsample_conv_transpose2d.1
= control target key start
LH: loop header
LB: loop body
LE: loop exit
PB: predicated region body
PF: predicated region fallthrough
CT: control target
= control target key end

     0   :  { %s572_s9 = smov 0   ;;  %s574_s10 = smov 0   ;;  %s639_s0 = inlined_call_operand.vmem [shape: f32[2,4,256], index: 0, kind: input, shape index: {}]   ;;  %s640_s1 = inlined_call_operand.vmem [shape: f32[32,4], index: 1, kind: input, shape index: {}]   ;;  %s641_s2 = inlined_call_operand.vmem [shape: f32[2,32,256], index: 2, kind: output, shape index: {}]  }
   0x1   :  { %s576_s11 = smov 0  }
   0x2 LB: > { %s24_s12 = sadd.s32 1, %s547_s10  ;;  %p484_p0 = scmp.ge.s32.totalorder %s551_s11, 1  ;;  %s551_s11 = sphi %s576_s11, %s12_s11   ;;  %s547_s10 = sphi %s574_s10, %s643_s10   ;;  %s543_s9 = sphi %s572_s9, %s642_s9  }
   0x3   : > { %p26_p1 = scmp.ge.s32.totalorder %s24_s12, 2  ;;  %p133_p2 = scmp.lt.s32.totalorder %s551_s11, 3 }
   0x5   : > { %s645_s12 = smov (%p26_p1, %s24_s12), 0  ;;  %p134_p3 = pnand %p484_p0, %p133_p2 }
   0x6   : > { %p164_p4 = scmp.lt.s32.totalorder (!%p134_p3), %s543_s9, 1 }
   0x7   : > { %137 = sbr.rel (%p134_p3) target bundleno = 178 (0xb2), region = 28 }
   0xc   : > { %v186_v0 = vld [vmem:[%s640_s1 + $0x10] sm:$0xff]  ;;  %v184_v1 = vld [vmem:[%s640_s1] sm:$0xff]  ;;  %v553_v2 = vmov 0   ;;  %v187_v3 = vld [vmem:[%s640_s1 + $0x18] sm:$0xff]  ;;  %v554_v5 = vmov 1   ;;  %v555_v6 = vmov 2   ;;  %v209_v8 = vlaneseq }
   0xd   : > { %522 = vset.pattern.permute.xlu1 %v553_v2  ;;  %521 = vset.pattern.permute.xlu0 %v553_v2  ;;  %v185_v4 = vld [vmem:[%s640_s1 + $0x8] sm:$0xff]  ;;  %v556_v7 = vmov 3   ;;  %s647_s9 = smov (!%p164_p4, %s543_s9), 1 }
   0xe   : > { %200 = vperm.xlu1 %522, %v186_v0   ;;  %190 = vperm.xlu0 %521, %v184_v1   ;;  %s491_s21 = sshll.u32 %s647_s9, 3  ;;  %v210_v11 = vshrl.u32 %v209_v8, 7  ;;  %s492_s25 = sshll.u32 %s647_s9, 6 }
   0xf   : > { %s171_s24 = scalar_lea.vmem %s639_s0, %s491_s21  ;;  %s618_s28 = scalar_lea.vmem %s641_s2, %s492_s25 }
  0x10   : > { %v253_v14 = vsub.s32 1, %v210_v11  ;;  %v257_v15 = vsub.s32 5, %v210_v11  ;;  %v211_v16 = vsub.s32 0, %v210_v11  ;;  %v215_v17 = vsub.s32 4, %v210_v11  ;;  %v183_v18 = vld [vmem:[%s171_s24] sm:$0xff] }
  0x11   : > { %v303_v19 = vsub.s32 2, %v210_v11  ;;  %v307_v20 = vsub.s32 6, %v210_v11  ;;  %v353_v29 = vsub.s32 3, %v210_v11  ;;  %v357_v30 = vsub.s32 7, %v210_v11 }
  0x12   : > { %205 = vperm.xlu1 %522, %v187_v3   ;;  %195 = vperm.xlu0 %521, %v185_v4   ;;  %v254_v23 = vrot.slane %v183_v18, %v253_v14  ;;  %v258_v24 = vrot.slane %v183_v18, %v257_v15  ;;  %v212_v25 = vrot.slane %v183_v18, %v211_v16 }
  0x13   : > { %v216_v26 = vrot.slane %v183_v18, %v215_v17  ;;  %v304_v27 = vrot.slane %v183_v18, %v303_v19  ;;  %v308_v28 = vrot.slane %v183_v18, %v307_v20  ;;  %v354_v39 = vrot.slane %v183_v18, %v353_v29 }
  0x14   : > { %v264_v33 = vrot.slane %v254_v23, %v253_v14  ;;  %v268_v34 = vrot.slane %v258_v24, %v253_v14  ;;  %v222_v35 = vrot.slane %v212_v25, %v211_v16  ;;  %v358_v40 = vrot.slane %v183_v18, %v357_v30 }
  0x15   : > { %v226_v36 = vrot.slane %v216_v26, %v211_v16  ;;  %v314_v37 = vrot.slane %v304_v27, %v303_v19  ;;  %v318_v38 = vrot.slane %v308_v28, %v303_v19  ;;  %v364_v49 = vrot.slane %v354_v39, %v353_v29 }
  0x16   : > { %524 = vset.pattern.permute.xlu1 %v554_v5  ;;  %523 = vset.pattern.permute.xlu0 %v554_v5  ;;  %v368_v50 = vrot.slane %v358_v40, %v353_v29 }
  0x17   : > { %240 = vperm.xlu1 %524, %v185_v4   ;;  %236 = vperm.xlu0 %523, %v184_v1  }
  0x1b   : > { %244 = vperm.xlu1 %524, %v186_v0   ;;  %248 = vperm.xlu0 %523, %v187_v3  }
  0x1f   : > { %525 = vset.pattern.permute.xlu1 %v555_v6  ;;  %526 = vset.pattern.permute.xlu0 %v555_v6 }
  0x20   : > { %286 = vperm.xlu1 %525, %v184_v1   ;;  %290 = vperm.xlu0 %526, %v185_v4  }
  0x24   : > { %294 = vperm.xlu1 %525, %v186_v0   ;;  %527 = vset.pattern.permute.xlu0 %v556_v7 }
  0x25   : > { %336 = vperm.xlu0 %527, %v184_v1  }
  0x28   : > { %298 = vperm.xlu1 %525, %v187_v3  }
  0x29   : > { %348 = vperm.xlu0 %527, %v187_v3  }
  0x2c   : > { %528 = vset.pattern.permute.xlu1 %v556_v7 }
  0x2d   : > { %340 = vperm.xlu1 %528, %v185_v4  }
  0x31   : > { %344 = vperm.xlu1 %528, %v186_v0  }
  0x89   : > { %v608_v9 = vpop.permute.xlu1 %200  ;;  %v191_v10 = vpop.permute.xlu0 %190 }
  0x8a   : > { %v227_v41 = vmul.f32 %v222_v35, %v191_v10  ;;  %v228_v42 = vmul.f32 %v226_v36, %v191_v10  ;;  %v231_v20 = vmul.f32 %v222_v35, %v608_v9 }
  0x8d   : > { %v206_v12 = vpop.permute.xlu1 %205  ;;  %v196_v13 = vpop.permute.xlu0 %195 }
  0x8e   : > { %v233_v56 = vmul.f32 %v222_v35, %v206_v12  ;;  %v234_v57 = vmul.f32 %v226_v36, %v206_v12  ;;  %v229_v63 = vmul.f32 %v222_v35, %v196_v13  ;;  %v230_v0 = vmul.f32 %v226_v36, %v196_v13 }
  0x92   : > { %v241_v21 = vpop.permute.xlu1 %240  ;;  %v237_v22 = vpop.permute.xlu0 %236 }
  0x93   : > { %v269_v43 = vmul.f32 %v264_v33, %v237_v22  ;;  %v270_v44 = vmul.f32 %v268_v34, %v237_v22  ;;  %v271_v1 = vmul.f32 %v264_v33, %v241_v21  ;;  %v272_v2 = vmul.f32 %v268_v34, %v241_v21 }
  0x94   : > { %v232_v21 = vmul.f32 %v226_v36, %v608_v9 }
  0x95   : > { %v277_v51 = vadd.f32 %v269_v43, %v227_v41  ;;  %v278_v52 = vadd.f32 %v270_v44, %v228_v42  ;;  %v279_v16 = vadd.f32 %v271_v1, %v229_v63  ;;  %v280_v17 = vadd.f32 %v272_v2, %v230_v0 }
  0x96   : > { %v245_v31 = vpop.permute.xlu1 %244  ;;  %v249_v32 = vpop.permute.xlu0 %248 }
  0x97   : > { %v275_v53 = vmul.f32 %v264_v33, %v249_v32  ;;  %v276_v54 = vmul.f32 %v268_v34, %v249_v32  ;;  %v273_v22 = vmul.f32 %v264_v33, %v245_v31  ;;  %v274_v23 = vmul.f32 %v268_v34, %v245_v31 }
  0x99   : > { %v283_v3 = vadd.f32 %v275_v53, %v233_v56  ;;  %v284_v4 = vadd.f32 %v276_v54, %v234_v57  ;;  %v281_v35 = vadd.f32 %v273_v22, %v231_v20  ;;  %v282_v40 = vadd.f32 %v274_v23, %v232_v21 }
  0x9b   : > { %v287_v45 = vpop.permute.xlu1 %286  ;;  %v291_v46 = vpop.permute.xlu0 %290 }
  0x9c   : > { %v319_v47 = vmul.f32 %v314_v37, %v287_v45  ;;  %v320_v48 = vmul.f32 %v318_v38, %v287_v45  ;;  %v321_v8 = vmul.f32 %v314_v37, %v291_v46  ;;  %v322_v10 = vmul.f32 %v318_v38, %v291_v46 }
  0x9e   : > { %v327_v59 = vadd.f32 %v319_v47, %v277_v51  ;;  %v328_v60 = vadd.f32 %v320_v48, %v278_v52  ;;  %v329_v24 = vadd.f32 %v321_v8, %v279_v16  ;;  %v330_v25 = vadd.f32 %v322_v10, %v280_v17 }
  0x9f   : > { %v295_v55 = vpop.permute.xlu1 %294 }
  0xa0   : > { %v337_v58 = vpop.permute.xlu0 %336  ;;  %v323_v29 = vmul.f32 %v314_v37, %v295_v55  ;;  %v324_v30 = vmul.f32 %v318_v38, %v295_v55 }
  0xa1   : > { %v369_v61 = vmul.f32 %v364_v49, %v337_v58  ;;  %v370_v62 = vmul.f32 %v368_v50, %v337_v58 }
  0xa2   : > { %v331_v34 = vadd.f32 %v323_v29, %v281_v35  ;;  %v332_v36 = vadd.f32 %v324_v30, %v282_v40 }
  0xa3   : > { %v377_v5 = vadd.f32 %v369_v61, %v327_v59  ;;  %v378_v6 = vadd.f32 %v370_v62, %v328_v60  ;;  %v299_v7 = vpop.permute.xlu1 %298 }
  0xa4   : > { %v325_v11 = vmul.f32 %v314_v37, %v299_v7  ;;  %v326_v12 = vmul.f32 %v318_v38, %v299_v7  ;;  %v349_v14 = vpop.permute.xlu0 %348 }
  0xa5   : > { %385 = vst [vmem:[%s618_s28] sm:$0xff] %v377_v5  ;;  %386 = vst [vmem:[%s618_s28 + $0x8] sm:$0xff] %v378_v6  ;;  %v375_v13 = vmul.f32 %v364_v49, %v349_v14  ;;  %v376_v15 = vmul.f32 %v368_v50, %v349_v14 }
  0xa6   : > { %v333_v18 = vadd.f32 %v325_v11, %v283_v3  ;;  %v334_v19 = vadd.f32 %v326_v12, %v284_v4 }
  0xa8   : > { %v383_v26 = vadd.f32 %v375_v13, %v333_v18  ;;  %v384_v27 = vadd.f32 %v376_v15, %v334_v19  ;;  %v341_v28 = vpop.permute.xlu1 %340 }
  0xa9   : > { %v371_v32 = vmul.f32 %v364_v49, %v341_v28  ;;  %v372_v39 = vmul.f32 %v368_v50, %v341_v28 }
  0xaa   : > { %391 = vst [vmem:[%s618_s28 + $0x30] sm:$0xff] %v383_v26  ;;  %392 = vst [vmem:[%s618_s28 + $0x38] sm:$0xff] %v384_v27 }
  0xab   : > { %v379_v9 = vadd.f32 %v371_v32, %v329_v24  ;;  %v380_v33 = vadd.f32 %v372_v39, %v330_v25 }
  0xac   : > { %v345_v31 = vpop.permute.xlu1 %344 }
  0xad   : > { %387 = vst [vmem:[%s618_s28 + $0x10] sm:$0xff] %v379_v9  ;;  %388 = vst [vmem:[%s618_s28 + $0x18] sm:$0xff] %v380_v33  ;;  %v373_v41 = vmul.f32 %v364_v49, %v345_v31  ;;  %v374_v42 = vmul.f32 %v368_v50, %v345_v31 }
  0xaf   : > { %v381_v43 = vadd.f32 %v373_v41, %v331_v34  ;;  %v382_v37 = vadd.f32 %v374_v42, %v332_v36 }
  0xb1   : > { %389 = vst [vmem:[%s618_s28 + $0x20] sm:$0xff] %v381_v43  ;;  %390 = vst [vmem:[%s618_s28 + $0x28] sm:$0xff] %v382_v37 }
  0xb2 PF: > { %s12_s11 = sadd.s32 1, %s551_s11   ;;  %s642_s9 = smov %s547_s10 }
  0xb3   : > { %p9_p5 = scmp.ge.s32.totalorder %s12_s11, 4   ;;  %s643_s10 = smov %s645_s12 }
  0xb5   :  { %11 = sbr.rel (!%p9_p5) target bundleno = 2 (0x2), region = 58 }

</bundles_post_ra>
